<compile_context>
chip_gen: v7x
topology: tpu7x:2x2x1
jax: 0.10.0
libtpu: 0.0.40
codegen_flags: <defaults>
</compile_context>

<pallas_src>
import functools

import jax
import jax.numpy as jnp
from jax import lax
from jax.experimental import pallas as pl
from jax.experimental.pallas import tpu as pltpu


def _conv1d_relu_kernel(x_ref, w_ref, b_ref, o_ref, *scratch,
                        K, TL, pad_l, prepadded, use_im2col):
    """One grid step = Nb batch elements x one L tile.

    x_ref : (Nb, Cin, TL)          if not prepadded (whole-L tile, no halo)
            (Nb, Cin, TL + K - 1)  if prepadded (halo materialized by wrapper)
    w_ref : (K, Cout, Cin)         direct path (use_im2col=False)
            (Cout, K*Cin)          im2col path (use_im2col=True)
    b_ref : (Cout, 1) f32
    o_ref : (Nb, Cout, TL)
    scratch: [xpad (Nb, Cin, TL+K-1)]   if not prepadded
             [+ xcol (K*Cin, Nb*TL)]    if use_im2col
    """
    Nb, Cin = x_ref.shape[0], x_ref.shape[1]

    si = 0
    if prepadded:
        xp = x_ref                                    # halo already present
    else:
        xp = scratch[si]
        si += 1
        pad_r = xp.shape[-1] - TL - pad_l
        # 'same' zero padding: zero ONLY the boundary slivers, never the
        # whole buffer (review: remove the full memset from the build phase).
        if pad_l > 0:
            xp[:, :, 0:pad_l] = jnp.zeros((Nb, Cin, pad_l), dtype=xp.dtype)
        if pad_r > 0:
            xp[:, :, pad_l + TL:pad_l + TL + pad_r] = (
                jnp.zeros((Nb, Cin, pad_r), dtype=xp.dtype))
        xp[:, :, pad_l:pad_l + TL] = x_ref[...]

    bias = b_ref[...].astype(jnp.float32)             # (Cout, 1)

    if use_im2col:
        # Large contraction: one MXU matmul over all taps & the blocked batch.
        xcol = scratch[si]
        for b in range(Nb):
            for k in range(K):
                xcol[k * Cin:(k + 1) * Cin, b * TL:(b + 1) * TL] = (
                    xp[b, :, k:k + TL])
        res = lax.dot_general(
            w_ref[...], xcol[...],
            dimension_numbers=(((1,), (0,)), ((), ())),
            preferred_element_type=jnp.float32)        # (Cout, Nb*TL) f32
        res = jnp.maximum(res + bias, 0.0).astype(o_ref.dtype)
        for b in range(Nb):
            o_ref[b] = res[:, b * TL:(b + 1) * TL]
    else:
        # Small contraction (K*Cin < 128): skip im2col, accumulate K matmuls
        # of W_k(Cout,Cin) @ x_shifted(Cin,TL) -- zero extra VMEM store
        # traffic beyond the (optional) pad-buffer body copy.
        for b in range(Nb):
            acc = None
            for k in range(K):
                c = lax.dot_general(
                    w_ref[k], xp[b, :, k:k + TL],
                    dimension_numbers=(((1,), (0,)), ((), ())),
                    preferred_element_type=jnp.float32)
                acc = c if acc is None else acc + c
            o_ref[b] = jnp.maximum(acc + bias, 0.0).astype(o_ref.dtype)


def _largest_divisor_le(n, cap):
    cap = max(1, min(n, cap))
    for d in range(cap, 0, -1):
        if n % d == 0:
            return d
    return 1


def _choose_l_tile(L, Cin, Cout, K, in_isz, out_isz, use_im2col,
                   budget_bytes=16 << 20):
    """Pick an L tile against a VMEM budget that is safe for v7x's 64 MiB
    (roughly half of what v5e/v6e's 128 MiB could take)."""
    def footprint(tl, halo):
        fp = 2 * Cin * (tl + (K - 1 if halo else 0)) * in_isz   # x, dbl-buffered
        fp += 2 * Cout * tl * out_isz                           # out, dbl-buffered
        fp += Cout * tl * 4                                     # f32 accumulator
        if not halo:
            fp += Cin * (tl + K - 1) * in_isz                   # in-kernel pad buf
        if use_im2col:
            fp += K * Cin * tl * in_isz                         # im2col scratch
        return fp

    if footprint(L, halo=False) <= budget_bytes:
        return L, 1                                             # whole L per step
    best = None
    for tl in (4096, 2048, 1024, 512, 256, 128):
        if tl >= L or footprint(tl, halo=True) > budget_bytes:
            continue
        n_lt = -(-L // tl)
        waste = n_lt * tl - L
        if best is None or waste < best[2]:
            best = (tl, n_lt, waste)
    if best is not None:
        return best[0], best[1]
    return 128, -(-L // 128)


def conv1d_block(x_ncl, weight, bias, *, compute_dtype=None):
    """Forward of Conv1DBlock: Conv1d(padding='same', stride=1) + ReLU.

    x_ncl : (N, Cin, L)   -- PyTorch Conv1d NCL layout, kept end-to-end
    weight: (Cout, Cin, K)
    bias  : (Cout,)
    compute_dtype: optional MXU operand dtype (e.g. jnp.bfloat16); f32 accum.
    returns (N, Cout, L)
    """
    N, Cin, L = x_ncl.shape
    Cout, _, K = weight.shape
    out_dtype = x_ncl.dtype
    cdtype = (jnp.dtype(compute_dtype) if compute_dtype is not None
              else jnp.dtype(out_dtype))
    in_isz = cdtype.itemsize
    out_isz = jnp.dtype(out_dtype).itemsize

    # PyTorch padding='same' (stride=1, dilation=1): total K-1, left=(K-1)//2.
    pad_l = (K - 1) // 2
    pad_r = (K - 1) - pad_l

    use_im2col = (K * Cin) >= 128   # only fill the contraction dim when worth it

    # ---- tiling decisions ---------------------------------------------------
    if L < 128:
        # Short sequences: block the batch so the matmul RHS / output store
        # width approaches 128 lanes and per-step overhead is amortized.
        TL, n_lt = L, 1
        Nb = _largest_divisor_le(N, min(-(-128 // L), 16))
    else:
        Nb = 1
        TL, n_lt = _choose_l_tile(L, Cin, Cout, K, in_isz, out_isz, use_im2col)
    # v7x has 2 TensorCores: keep >=2 parallel grid steps when each step has
    # enough work to amortize the ~0.35us step overhead.
    if N // Nb == 1 and n_lt == 1 and N > 1 and Nb * TL >= 256:
        Nb = _largest_divisor_le(N, max(1, Nb // 2))

    Lp = TL * n_lt
    TLh = TL + K - 1
    prepadded = n_lt > 1            # halo from the wrapper only when L is tiled

    # ---- inputs -------------------------------------------------------------
    xw = x_ncl.astype(cdtype)       # no-op when compute_dtype is None
    if prepadded:
        # Materialize halo'd L tiles: (n_lt, N, Cin, TL + K - 1).
        xp_full = jnp.pad(xw, ((0, 0), (0, 0), (pad_l, pad_r + (Lp - L))))
        win = jnp.arange(n_lt)[:, None] * TL + jnp.arange(TLh)[None, :]
        x_in = jnp.transpose(xp_full[:, :, win], (2, 0, 1, 3))
        x_spec = pl.BlockSpec((None, Nb, Cin, TLh), lambda n, l: (l, n, 0, 0))
    else:
        x_in = xw                                   # untouched (N, Cin, L)
        x_spec = pl.BlockSpec((Nb, Cin, TL), lambda n, l: (n, 0, 0))

    if use_im2col:
        w_in = jnp.transpose(weight, (0, 2, 1)).reshape(Cout, K * Cin).astype(cdtype)
        w_spec = pl.BlockSpec((Cout, K * Cin), lambda n, l: (0, 0))
    else:
        w_in = jnp.transpose(weight, (2, 0, 1)).astype(cdtype)   # (K, Cout, Cin)
        w_spec = pl.BlockSpec((K, Cout, Cin), lambda n, l: (0, 0, 0))
    b_in = bias.astype(jnp.float32).reshape(Cout, 1)

    scratch = []
    if not prepadded:
        scratch.append(pltpu.VMEM((Nb, Cin, TLh), cdtype))        # pad buffer
    if use_im2col:
        # TODO(synk): pad Cin to a sublane-tile multiple (8 f32 / 16 bf16) so
        # per-tap im2col writes land on (8,128) boundaries when Cin % 8 != 0.
        scratch.append(pltpu.VMEM((K * Cin, Nb * TL), cdtype))    # im2col

    # ---- explicit VMEM limit (don't rely on the 16/32 MiB scoped defaults,
    # stay under v7x's 64 MiB physical) ---------------------------------------
    fp = 2 * (Nb * Cin * TLh * in_isz + Nb * Cout * TL * out_isz)
    fp += Nb * Cout * TL * 4 + w_in.size * in_isz + Cout * 4
    if not prepadded:
        fp += Nb * Cin * TLh * in_isz
    if use_im2col:
        fp += K * Cin * Nb * TL * in_isz
    vmem_limit = int(min(max(2 * fp + (4 << 20), 32 << 20), 48 << 20))

    kernel = functools.partial(_conv1d_relu_kernel, K=K, TL=TL, pad_l=pad_l,
                               prepadded=prepadded, use_im2col=use_im2col)

    out = pl.pallas_call(
        kernel,
        out_shape=jax.ShapeDtypeStruct((N, Cout, Lp), out_dtype),
        grid=(N // Nb, n_lt),
        in_specs=[
            x_spec,
            w_spec,
            pl.BlockSpec((Cout, 1), lambda n, l: (0, 0)),         # bias (resident)
        ],
        out_specs=pl.BlockSpec((Nb, Cout, TL), lambda n, l: (n, 0, l)),
        scratch_shapes=scratch,
        compiler_params=pltpu.CompilerParams(
            dimension_semantics=("parallel", "parallel"),
            vmem_limit_bytes=vmem_limit),
        cost_estimate=pl.CostEstimate(
            flops=2 * N * Cout * L * K * Cin,
            transcendentals=0,
            bytes_accessed=(x_in.size * in_isz + w_in.size * in_isz
                            + b_in.size * 4 + N * Cout * Lp * out_isz)),
    )(x_in, w_in, b_in)

    return out if Lp == L else out[:, :, :L]


if __name__ == "__main__":
    def make_inputs(key, N, Cin, Cout, L, K):
        kx, kw, kb = jax.random.split(key, 3)
        bound = 1.0 / (Cin * K) ** 0.5
        x = jax.random.normal(kx, (N, Cin, L), dtype=jnp.float32)
        w = jax.random.uniform(kw, (Cout, Cin, K), minval=-bound, maxval=bound,
                               dtype=jnp.float32)
        b = jax.random.uniform(kb, (Cout,), minval=-bound, maxval=bound,
                               dtype=jnp.float32)
        return x, w, b

    def reference(x, w, b):
        # PyTorch Conv1d 'same': left = (K-1)//2, right = (K-1) - left.
        K = w.shape[-1]
        pad_l = (K - 1) // 2
        pad_r = (K - 1) - pad_l
        y = lax.conv_general_dilated(
            x, w, window_strides=(1,), padding=[(pad_l, pad_r)],
            dimension_numbers=("NCH", "OIH", "NCH"))
        return jnp.maximum(y + b[None, :, None], 0.0)

    run = jax.jit(conv1d_block, static_argnames=("compute_dtype",))

    # 1) Conv1DBlock(4, 8, 3), N=2, L=16  -> direct (no-im2col), batch-blocked.
    x, w, b = make_inputs(jax.random.PRNGKey(0), 2, 4, 8, 16, 3)
    out = jax.block_until_ready(run(x, w, b))
    assert out.shape == (2, 8, 16)
    assert jnp.allclose(out, reference(x, w, b), atol=1e-4, rtol=1e-4)

    # 2) Even kernel size (asymmetric 'same' padding), Cin not a multiple of 8.
    x2, w2, b2 = make_inputs(jax.random.PRNGKey(1), 2, 3, 8, 16, 4)
    out2 = jax.block_until_ready(run(x2, w2, b2))
    assert jnp.allclose(out2, reference(x2, w2, b2), atol=1e-4, rtol=1e-4)

    # 3) Larger channel count -> im2col path (K*Cin >= 128).
    x3, w3, b3 = make_inputs(jax.random.PRNGKey(2), 4, 48, 8, 16, 3)
    out3 = jax.block_until_ready(run(x3, w3, b3))
    assert jnp.allclose(out3, reference(x3, w3, b3), atol=5e-4, rtol=5e-4)

    # 4) bf16 MXU operands with f32 accumulation (review: feed the MXU bf16).
    out4 = jax.block_until_ready(run(x, w, b, compute_dtype=jnp.bfloat16))
    assert jnp.allclose(out4, reference(x, w, b), atol=5e-2, rtol=5e-2)

    print("KERNEL_OK")
</pallas_src>

<mosaic_0001>
module attributes {stable_mosaic.version = 11 : i64} {
  func.func @_conv1d_relu_kernel(%arg0: i32, %arg1: i32, %arg2: memref<2x4x16xf32, #tpu.memory_space<vmem>>, %arg3: memref<3x8x4xf32, #tpu.memory_space<vmem>>, %arg4: memref<8x1xf32, #tpu.memory_space<vmem>>, %arg5: memref<2x8x16xf32, #tpu.memory_space<vmem>>, %arg6: memref<2x4x18xf32, #tpu.memory_space<vmem>>) attributes {dimension_semantics = [#tpu.dimension_semantics<parallel>, #tpu.dimension_semantics<parallel>], iteration_bounds = array<i64: 1, 1>, scalar_prefetch = 0 : i64, scratch_operands = 1 : i64, tpu.core_type = #tpu.core_type<tc>, window_params = [{transform_indices = @transform_0, window_bounds = array<i64: 2, 4, 16>}, {pipeline_mode = #tpu.pipeline_mode<synchronous>, transform_indices = @transform_1, window_bounds = array<i64: 3, 8, 4>}, {pipeline_mode = #tpu.pipeline_mode<synchronous>, transform_indices = @transform_2, window_bounds = array<i64: 8, 1>}, {transform_indices = @transform_3, window_bounds = array<i64: 2, 8, 16>}]} {
    %cst = arith.constant 0.000000e+00 : f32
    %0 = vector.broadcast %cst : f32 to vector<2x4x1xf32>
    %c0 = arith.constant 0 : index
    %c0_0 = arith.constant 0 : index
    %c0_1 = arith.constant 0 : index
    %1 = vector.load %arg6[%c0, %c0_0, %c0_1] : memref<2x4x18xf32, #tpu.memory_space<vmem>>, vector<2x4x1xf32>
    tpu.vector_store %arg6[%c0, %c0_0, %c0_1], %0 {strides = array<i32>} : memref<2x4x18xf32, #tpu.memory_space<vmem>>, vector<2x4x1xf32>,
    %cst_2 = arith.constant 0.000000e+00 : f32
    %2 = vector.broadcast %cst_2 : f32 to vector<2x4x1xf32>
    %c0_3 = arith.constant 0 : index
    %c0_4 = arith.constant 0 : index
    %c17 = arith.constant 17 : index
    %3 = vector.load %arg6[%c0_3, %c0_4, %c17] : memref<2x4x18xf32, #tpu.memory_space<vmem>>, vector<2x4x1xf32>
    tpu.vector_store %arg6[%c0_3, %c0_4, %c17], %2 {strides = array<i32>} : memref<2x4x18xf32, #tpu.memory_space<vmem>>, vector<2x4x1xf32>,
    %c0_5 = arith.constant 0 : index
    %c0_6 = arith.constant 0 : index
    %c0_7 = arith.constant 0 : index
    %4 = vector.load %arg2[%c0_5, %c0_6, %c0_7] : memref<2x4x16xf32, #tpu.memory_space<vmem>>, vector<2x4x16xf32>
    %c0_8 = arith.constant 0 : index
    %c0_9 = arith.constant 0 : index
    %c1 = arith.constant 1 : index
    %5 = vector.load %arg6[%c0_8, %c0_9, %c1] : memref<2x4x18xf32, #tpu.memory_space<vmem>>, vector<2x4x16xf32>
    tpu.vector_store %arg6[%c0_8, %c0_9, %c1], %4 {strides = array<i32>} : memref<2x4x18xf32, #tpu.memory_space<vmem>>, vector<2x4x16xf32>,
    %c0_10 = arith.constant 0 : index
    %c0_11 = arith.constant 0 : index
    %6 = vector.load %arg4[%c0_10, %c0_11] : memref<8x1xf32, #tpu.memory_space<vmem>>, vector<8x1xf32>
    %c0_12 = arith.constant 0 : index
    %c0_13 = arith.constant 0 : index
    %c0_14 = arith.constant 0 : index
    %7 = vector.load %arg3[%c0_12, %c0_13, %c0_14] : memref<3x8x4xf32, #tpu.memory_space<vmem>>, vector<1x8x4xf32>
    %8 = vector.shape_cast %7 : vector<1x8x4xf32> to vector<8x4xf32>
    %c0_15 = arith.constant 0 : index
    %c0_16 = arith.constant 0 : index
    %c0_17 = arith.constant 0 : index
    %9 = vector.load %arg6[%c0_15, %c0_16, %c0_17] : memref<2x4x18xf32, #tpu.memory_space<vmem>>, vector<1x4x16xf32>
    %10 = vector.shape_cast %9 : vector<1x4x16xf32> to vector<4x16xf32>
    %cst_18 = arith.constant dense<0.000000e+00> : vector<8x16xf32>
    %11 = tpu.matmul %8, %10, %cst_18 {dimension_numbers = #tpu.dot_dimension_numbers<[1], [0], [0], [1], [0, 0, 1, 1], [], []>} : vector<8x4xf32>, vector<4x16xf32>, vector<8x16xf32> -> vector<8x16xf32>
    %c1_19 = arith.constant 1 : index
    %c0_20 = arith.constant 0 : index
    %c0_21 = arith.constant 0 : index
    %12 = vector.load %arg3[%c1_19, %c0_20, %c0_21] : memref<3x8x4xf32, #tpu.memory_space<vmem>>, vector<1x8x4xf32>
    %13 = vector.shape_cast %12 : vector<1x8x4xf32> to vector<8x4xf32>
    %c0_22 = arith.constant 0 : index
    %c0_23 = arith.constant 0 : index
    %c1_24 = arith.constant 1 : index
    %14 = vector.load %arg6[%c0_22, %c0_23, %c1_24] : memref<2x4x18xf32, #tpu.memory_space<vmem>>, vector<1x4x16xf32>
    %15 = vector.shape_cast %14 : vector<1x4x16xf32> to vector<4x16xf32>
    %cst_25 = arith.constant dense<0.000000e+00> : vector<8x16xf32>
    %16 = tpu.matmul %13, %15, %cst_25 {dimension_numbers = #tpu.dot_dimension_numbers<[1], [0], [0], [1], [0, 0, 1, 1], [], []>} : vector<8x4xf32>, vector<4x16xf32>, vector<8x16xf32> -> vector<8x16xf32>
    %17 = arith.addf %11, %16 : vector<8x16xf32>
    %c2 = arith.constant 2 : index
    %c0_26 = arith.constant 0 : index
    %c0_27 = arith.constant 0 : index
    %18 = vector.load %arg3[%c2, %c0_26, %c0_27] : memref<3x8x4xf32, #tpu.memory_space<vmem>>, vector<1x8x4xf32>
    %19 = vector.shape_cast %18 : vector<1x8x4xf32> to vector<8x4xf32>
    %c0_28 = arith.constant 0 : index
    %c0_29 = arith.constant 0 : index
    %c2_30 = arith.constant 2 : index
    %20 = vector.load %arg6[%c0_28, %c0_29, %c2_30] : memref<2x4x18xf32, #tpu.memory_space<vmem>>, vector<1x4x16xf32>
    %21 = vector.shape_cast %20 : vector<1x4x16xf32> to vector<4x16xf32>
    %cst_31 = arith.constant dense<0.000000e+00> : vector<8x16xf32>
    %22 = tpu.matmul %19, %21, %cst_31 {dimension_numbers = #tpu.dot_dimension_numbers<[1], [0], [0], [1], [0, 0, 1, 1], [], []>} : vector<8x4xf32>, vector<4x16xf32>, vector<8x16xf32> -> vector<8x16xf32>
    %23 = arith.addf %17, %22 : vector<8x16xf32>
    %24 = vector.broadcast %6 : vector<8x1xf32> to vector<8x16xf32>
    %25 = arith.addf %23, %24 : vector<8x16xf32>
    %cst_32 = arith.constant 0.000000e+00 : f32
    %26 = vector.broadcast %cst_32 : f32 to vector<8x16xf32>
    %27 = arith.maximumf %25, %26 : vector<8x16xf32>
    %c0_33 = arith.constant 0 : index
    %c0_34 = arith.constant 0 : index
    %c0_35 = arith.constant 0 : index
    %28 = vector.load %arg5[%c0_33, %c0_34, %c0_35] : memref<2x8x16xf32, #tpu.memory_space<vmem>>, vector<1x8x16xf32>
    %29 = vector.shape_cast %28 : vector<1x8x16xf32> to vector<8x16xf32>
    %30 = vector.shape_cast %27 : vector<8x16xf32> to vector<1x8x16xf32>
    tpu.vector_store %arg5[%c0_33, %c0_34, %c0_35], %30 {strides = array<i32>} : memref<2x8x16xf32, #tpu.memory_space<vmem>>, vector<1x8x16xf32>,
    %c0_36 = arith.constant 0 : index
    %c0_37 = arith.constant 0 : index
    %c0_38 = arith.constant 0 : index
    %31 = vector.load %arg3[%c0_36, %c0_37, %c0_38] : memref<3x8x4xf32, #tpu.memory_space<vmem>>, vector<1x8x4xf32>
    %32 = vector.shape_cast %31 : vector<1x8x4xf32> to vector<8x4xf32>
    %c1_39 = arith.constant 1 : index
    %c0_40 = arith.constant 0 : index
    %c0_41 = arith.constant 0 : index
    %33 = vector.load %arg6[%c1_39, %c0_40, %c0_41] : memref<2x4x18xf32, #tpu.memory_space<vmem>>, vector<1x4x16xf32>
    %34 = vector.shape_cast %33 : vector<1x4x16xf32> to vector<4x16xf32>
    %cst_42 = arith.constant dense<0.000000e+00> : vector<8x16xf32>
    %35 = tpu.matmul %32, %34, %cst_42 {dimension_numbers = #tpu.dot_dimension_numbers<[1], [0], [0], [1], [0, 0, 1, 1], [], []>} : vector<8x4xf32>, vector<4x16xf32>, vector<8x16xf32> -> vector<8x16xf32>
    %c1_43 = arith.constant 1 : index
    %c0_44 = arith.constant 0 : index
    %c0_45 = arith.constant 0 : index
    %36 = vector.load %arg3[%c1_43, %c0_44, %c0_45] : memref<3x8x4xf32, #tpu.memory_space<vmem>>, vector<1x8x4xf32>
    %37 = vector.shape_cast %36 : vector<1x8x4xf32> to vector<8x4xf32>
    %c1_46 = arith.constant 1 : index
    %c0_47 = arith.constant 0 : index
    %c1_48 = arith.constant 1 : index
    %38 = vector.load %arg6[%c1_46, %c0_47, %c1_48] : memref<2x4x18xf32, #tpu.memory_space<vmem>>, vector<1x4x16xf32>
    %39 = vector.shape_cast %38 : vector<1x4x16xf32> to vector<4x16xf32>
    %cst_49 = arith.constant dense<0.000000e+00> : vector<8x16xf32>
    %40 = tpu.matmul %37, %39, %cst_49 {dimension_numbers = #tpu.dot_dimension_numbers<[1], [0], [0], [1], [0, 0, 1, 1], [], []>} : vector<8x4xf32>, vector<4x16xf32>, vector<8x16xf32> -> vector<8x16xf32>
    %41 = arith.addf %35, %40 : vector<8x16xf32>
    %c2_50 = arith.constant 2 : index
    %c0_51 = arith.constant 0 : index
    %c0_52 = arith.constant 0 : index
    %42 = vector.load %arg3[%c2_50, %c0_51, %c0_52] : memref<3x8x4xf32, #tpu.memory_space<vmem>>, vector<1x8x4xf32>
    %43 = vector.shape_cast %42 : vector<1x8x4xf32> to vector<8x4xf32>
    %c1_53 = arith.constant 1 : index
    %c0_54 = arith.constant 0 : index
    %c2_55 = arith.constant 2 : index
    %44 = vector.load %arg6[%c1_53, %c0_54, %c2_55] : memref<2x4x18xf32, #tpu.memory_space<vmem>>, vector<1x4x16xf32>
    %45 = vector.shape_cast %44 : vector<1x4x16xf32> to vector<4x16xf32>
    %cst_56 = arith.constant dense<0.000000e+00> : vector<8x16xf32>
    %46 = tpu.matmul %43, %45, %cst_56 {dimension_numbers = #tpu.dot_dimension_numbers<[1], [0], [0], [1], [0, 0, 1, 1], [], []>} : vector<8x4xf32>, vector<4x16xf32>, vector<8x16xf32> -> vector<8x16xf32>
    %47 = arith.addf %41, %46 : vector<8x16xf32>
    %48 = vector.broadcast %6 : vector<8x1xf32> to vector<8x16xf32>
    %49 = arith.addf %47, %48 : vector<8x16xf32>
    %cst_57 = arith.constant 0.000000e+00 : f32
    %50 = vector.broadcast %cst_57 : f32 to vector<8x16xf32>
    %51 = arith.maximumf %49, %50 : vector<8x16xf32>
    %c1_58 = arith.constant 1 : index
    %c0_59 = arith.constant 0 : index
    %c0_60 = arith.constant 0 : index
    %52 = vector.load %arg5[%c1_58, %c0_59, %c0_60] : memref<2x8x16xf32, #tpu.memory_space<vmem>>, vector<1x8x16xf32>
    %53 = vector.shape_cast %52 : vector<1x8x16xf32> to vector<8x16xf32>
    %54 = vector.shape_cast %51 : vector<8x16xf32> to vector<1x8x16xf32>
    tpu.vector_store %arg5[%c1_58, %c0_59, %c0_60], %54 {strides = array<i32>} : memref<2x8x16xf32, #tpu.memory_space<vmem>>, vector<1x8x16xf32>,
    return
  }
  func.func @transform_0(%arg0: i32, %arg1: i32) -> (i32, i32, i32) {
    %c0_i32 = arith.constant 0 : i32
    %c0_i32_0 = arith.constant 0 : i32
    %c0_i32_1 = arith.constant 0 : i32
    return %arg0, %c0_i32, %c0_i32_0 : i32, i32, i32
  }
  func.func @transform_1(%arg0: i32, %arg1: i32) -> (i32, i32, i32) {
    %c0_i32 = arith.constant 0 : i32
    %c0_i32_0 = arith.constant 0 : i32
    %c0_i32_1 = arith.constant 0 : i32
    %c0_i32_2 = arith.constant 0 : i32
    return %c0_i32, %c0_i32_0, %c0_i32_1 : i32, i32, i32
  }
  func.func @transform_2(%arg0: i32, %arg1: i32) -> (i32, i32) {
    %c0_i32 = arith.constant 0 : i32
    %c0_i32_0 = arith.constant 0 : i32
    %c0_i32_1 = arith.constant 0 : i32
    return %c0_i32, %c0_i32_0 : i32, i32
  }
  func.func @transform_3(%arg0: i32, %arg1: i32) -> (i32, i32, i32) {
    %c0_i32 = arith.constant 0 : i32
    %c0_i32_0 = arith.constant 0 : i32
    return %arg0, %c0_i32, %arg1 : i32, i32, i32
  }
}

</mosaic_0001>

<bundles_post_ra>
// kernel: conv1d_block.1
= control target key start
LH: loop header
LB: loop body
LE: loop exit
PB: predicated region body
PF: predicated region fallthrough
CT: control target
= control target key end

     0   :  { %s631_s14 = smov 1   ;;  %vm15_vm0 = vcmask 3072   ;;  %vm18_vm1 = vcmask 142472   ;;  %v632_v2 = vmov 0.0   ;;  %s708_s0 = inlined_call_operand.vmem [shape: f32[2,4,16], index: 0, kind: input, shape index: {}]   ;;  %s709_s1 = inlined_call_operand.vmem [shape: f32[3,8,4], index: 1, kind: input, shape index: {}]   ;;  %s710_s2 = inlined_call_operand.vmem [shape: f32[8,1], index: 2, kind: input, shape index: {}]   ;;  %s711_s3 = inlined_call_operand.hbm [shape: f32[2,8,16], index: 3, kind: output, shape index: {}]  }
   0x1   :  { %v21_v0 = vld [vmem:[%s708_s0] sm:$0xf]  ;;  %v22_v1 = vld [vmem:[%s708_s0 + $0x4] sm:$0xf]  ;;  %16 = vst.msk [vmem:[#allocation2] sm:$0xf] %vm15_vm0, %v632_v2  ;;  %572 = vmatprep.subr.mxu1 %v632_v2  ;;  %567 = vmatprep.subr.mxu0 %v632_v2 }
   0x2   :  { %25 = vrot.lane.b32.xlu0 %v21_v0, %s631_s14  ;;  %17 = vst.msk [vmem:[#allocation2 + $0x4] sm:$0xf] %vm15_vm0, %v632_v2 }
   0x3   :  { %8 = vsyncpa [#allocation4], 0  ;;  %19 = vst.msk [vmem:[#allocation2] sm:$0xf] %vm18_vm1, %v632_v2  ;;  %vm633_vm2 = vmmov 0   ;;  %vm31_vm3 = vcmask 134152  }
   0x4   :  { %20 = vst.msk [vmem:[#allocation2 + $0x4] sm:$0xf] %vm18_vm1, %v632_v2  ;;  %569 = vmatprep.mubr.msk.f32.mxu0 %vm633_vm2, %v632_v2  ;;  %574 = vmatprep.mubr.msk.f32.mxu1 %vm633_vm2, %v632_v2  ;;  %vm46_vm4 = vcmask 1043456   ;;  %vm42_vm5 = vcmask 31744   ;;  %v35_v5 = vld [vmem:[%s709_s1] sm:$0xff]  ;;  %v634_v7 = vmov 0  }
   0x5   :  { %606 = vset.pattern.permute.xlu0 %v634_v7  ;;  %s635_s18 = smov 127   ;;  %s636_s19 = smov 126   ;;  %v34_v9 = vld [vmem:[%s710_s2] sm:$0xff]  ;;  %v539_v10 = vld [vmem:[%s709_s1 + $0x8] sm:$0xff]  ;;  %v544_v12 = vld [vmem:[%s709_s1 + $0x10] sm:$0xff]  ;;  %vm281_vm6 = vcmask 130048  }
   0x6   :  { %27 = vrot.lane.b32.xlu0 %v22_v1, %s631_s14  ;;  %s637_s1 = smov [#allocation3]  }
   0x7   :  { %s528_s2 = sshll.u32 %s637_s1, 4  ;;  %s529_s2 = int_to_ptr.vmem [resolvable:$true] %s528_s2 }
   0x8   :  { %s607_s26 = scalar_lea.vmem %s529_s2, 256  ;;  %p612_p1 = scmp.lt.s32.totalorder %s529_s2, %s529_s2 }
   0x9   :  { %p608_p0 = scmp.ne.s32.totalorder %s529_s2, %s607_s26  ;;  %p613_p2 = scmp.lt.s32.totalorder %s607_s26, %s607_s26 }
   0xb   :  { %p614_p3 = por %p613_p2, %p612_p1 }
   0xd   :  { %p615_p4 = pnand %p614_p3, %p608_p0 }
  0x74   :  { %v26_v3 = vpop.permute.xlu0 %25 }
  0x75   :  { %32 = vst.msk [vmem:[#allocation2] sm:$0xf] %vm31_vm3, %v26_v3 }
  0x78   :  { %v28_v4 = vpop.permute.xlu0 %27 }
  0x79   :  { %33 = vst.msk [vmem:[#allocation2 + $0x4] sm:$0xf] %vm31_vm3, %v28_v4 }
  0x7c   :  { %v36_v6 = vld [vmem:[#allocation2] sm:$0xf] }
  0x7d   :  { %40 = vrot.lane.b32.xlu1 %v36_v6, %s635_s18  ;;  %573 = vmatpush3.msk.msra.mxu1 %vm46_vm4, %v36_v6 }
  0x7e   :  { %575 = vmatmul.mubr.msk.f32.vlgmr.msra.gmra.mrb[0].mxu1 %vm42_vm5, %v35_v5  ;;  %582 = vmatprep.subr.mxu1 %v632_v2 }
  0x7f   :  { %584 = vmatprep.mubr.msk.f32.mxu1 %vm633_vm2, %v632_v2 }
  0x80   :  { %v285_v8 = vld [vmem:[#allocation2 + $0x4] sm:$0xf] }
  0x81   :  { %196 = vrot.lane.b32.xlu1 %v36_v6, %s636_s19  ;;  %288 = vrot.lane.b32.xlu0 %v285_v8, %s635_s18 }
  0x85   :  { %441 = vrot.lane.b32.xlu1 %v285_v8, %s636_s19  ;;  %276 = vperm.xlu0 %606, %v34_v9  }
  0xef   :  { %v41_v11 = vpop.permute.xlu1 %40 }
  0xf0   :  { %568 = vmatpush3.msk.msra.mxu0 %vm46_vm4, %v41_v11 }
  0xf1   :  { %570 = vmatmul.mubr.msk.f32.vlgmr.msra.gmra.mrb[0].mxu0 %vm42_vm5, %v539_v10  ;;  %577 = vmatprep.subr.mxu0 %v632_v2 }
  0xf2   :  { %579 = vmatprep.mubr.msk.f32.mxu0 %vm633_vm2, %v632_v2 }
  0xf3   :  { %v197_v13 = vpop.permute.xlu1 %196  ;;  %v289_v14 = vpop.permute.xlu0 %288 }
  0xf4   :  { %578 = vmatpush3.msk.msra.mxu0 %vm46_vm4, %v197_v13  ;;  %583 = vmatpush3.msk.msra.mxu1 %vm46_vm4, %v289_v14 }
  0xf5   :  { %587 = vmatprep.subr.mxu0 %v632_v2  ;;  %580 = vmatmul.mubr.msk.f32.vlgmr.msra.gmra.mrb[2].mxu0 %vm42_vm5, %v544_v12 }
  0xf6   :  { %588 = vmatpush3.msk.msra.mxu0 %vm46_vm4, %v285_v8  ;;  %592 = vmatprep.subr.mxu1 %v632_v2 }
  0xf7   :  { %v442_v15 = vpop.permute.xlu1 %441  ;;  %585 = vmatmul.mubr.msk.f32.vlgmr.msra.gmra.mrb[2].mxu1 %vm42_vm5, %v539_v10  ;;  %589 = vmatprep.mubr.msk.f32.mxu0 %vm633_vm2, %v632_v2 }
  0xf8   :  { %593 = vmatpush3.msk.msra.mxu1 %vm46_vm4, %v442_v15  ;;  %594 = vmatprep.mubr.msk.f32.mxu1 %vm633_vm2, %v632_v2 }
  0xf9   :  { %590 = vmatmul.mubr.msk.f32.vlgmr.msra.gmra.mrb[4].mxu0 %vm42_vm5, %v35_v5 }
  0xfb   :  { %595 = vmatmul.mubr.msk.f32.vlgmr.msra.gmra.mrb[4].mxu1 %vm42_vm5, %v544_v12 }
 0x104   :  { %v277_v22 = vpop.permute.xlu0 %276 }
 0x151   :  { %v190_v16 = vpop.f32.mrb[0].mxu1 }
 0x152   :  { %v576_v17 = vpop.f32.mrb[1].mxu1 }
 0x1c4   :  { %v115_v18 = vpop.f32.mrb[0].mxu0 }
 0x1c5   :  { %v571_v19 = vpop.f32.mrb[1].mxu0  ;;  %v191_v20 = vadd.f32 %v190_v16, %v115_v18 }
 0x1c8   :  { %v269_v21 = vpop.f32.mrb[2].mxu0 }
 0x1c9   :  { %v273_v23 = vadd.f32 %v269_v21, %v191_v20  ;;  %v581_v24 = vpop.f32.mrb[3].mxu0 }
 0x1ca   :  { %v361_v25 = vpop.f32.mrb[2].mxu1 }
 0x1cb   :  { %v279_v26 = vadd.f32 %v277_v22, %v273_v23  ;;  %v586_v27 = vpop.f32.mrb[3].mxu1 }
 0x1cc   :  { %v436_v28 = vpop.f32.mrb[4].mxu0 }
 0x1cd   :  { %v280_v29 = vmax.f32 %v279_v26, 0.0  ;;  %v437_v30 = vadd.f32 %v436_v28, %v361_v25  ;;  %v591_v31 = vpop.f32.mrb[5].mxu0 }
 0x1ce   :  { %v514_v32 = vpop.f32.mrb[4].mxu1 }
 0x1cf   :  { %282 = vst.msk [vmem:[#allocation3] sm:$0xff] %vm281_vm6, %v280_v29  ;;  %v518_v33 = vadd.f32 %v514_v32, %v437_v30  ;;  %v596_v34 = vpop.f32.mrb[5].mxu1 }
 0x1d1   :  { %v519_v35 = vadd.f32 %v518_v33, %v277_v22 }
 0x1d3   :  { %v520_v36 = vmax.f32 %v519_v35, 0.0 }
 0x1d5   :  { %522 = vst.msk [vmem:[#allocation3 + $0x8] sm:$0xff] %vm281_vm6, %v520_v36 }
 0x1d6   :  { %618 = shalt.err (!%p615_p4)
}
 0x1d7   :  { %s619_s29 = scalar_lea.hbm %s711_s3, 256 }
 0x1d8   :  { %p620_p5 = scmp.ne.s32.totalorder %s711_s3, %s619_s29  ;;  %p623_p6 = scmp.lt.u32.totalorder %s619_s29, %s711_s3 }
 0x1da   :  { %p625_p7 = pnand %p623_p6, %p620_p5 }
 0x1dc   :  { %628 = shalt.err (!%p625_p7)
}
 0x1dd   :  { %s638_s7 = smov 128   ;;  %s639_s8 = smov 8  }
 0x1de   :  { %534 = dma.vmem_to_hbm [thread:$0]  %s529_s2, 256, %s711_s3, [#allocation4], %s638_s7, %s638_s7, %s639_s8  }
 0x1df   :  { %629 = dma.done.wait [#allocation4], 256  }
 0x1e0   :  { %630 = vsyncadd [#allocation4], 4294967040 }
 0x1e1   :  { %538 = vsyncpa [#allocation4], 1 }

</bundles_post_ra>
